<compile_context>
chip_gen: v7x
topology: tpu7x:2x2x1
jax: 0.10.0
libtpu: 0.0.40
codegen_flags: <defaults>
</compile_context>

<pallas_src>
import functools

import jax
import jax.numpy as jnp
from jax import lax
from jax.experimental import pallas as pl
from jax.experimental.pallas import tpu as pltpu

BLOCK_SIZE = 8
VOCAB_SIZE = 65    # stand-in for len(sorted(set(books)))  (tiny-shakespeare-like)
LANE_PAD = 128     # pad the vocab/lane dimension to a full vreg lane width

_VMEM = pl.BlockSpec(memory_space=pltpu.MemorySpace.VMEM)
_SMEM = pl.BlockSpec(memory_space=pltpu.MemorySpace.SMEM)


# ----------------------------------------------------------------------------
# Kernels
# ----------------------------------------------------------------------------
def _gather_block(idx_ref, ftok_ref, fpos_ref):
    """Build the (B*T, LANE_PAD) fused-logits block entirely in registers.

    block[b*T + t, :] = fused_tok[idx[b, t], :] + fused_pos[t, :]

    idx_ref is in SMEM: each row is one scalar read + one dynamic (1, 128)
    sublane row load.  The position table is loaded once and added as a bulk
    (T, 128) add per batch; no per-row stores happen here.
    """
    B, T = idx_ref.shape
    fpos = fpos_ref[...][:T]                                   # single hoisted load
    batch_blocks = []
    for b in range(B):
        rows = [ftok_ref[pl.ds(idx_ref[b, t], 1), :] for t in range(T)]
        batch_blocks.append(jnp.concatenate(rows, axis=0) + fpos)   # (T, 128)
    return jnp.concatenate(batch_blocks, axis=0)               # (B*T, 128)


def _logits_kernel(idx_ref, ftok_ref, fpos_ref, logits_ref, *, vocab):
    """Inference path: exact (B*T, vocab) logits, one slab store."""
    block = _gather_block(idx_ref, ftok_ref, fpos_ref)
    logits_ref[...] = block[:, :vocab]


def _logits_loss_kernel(idx_ref, tgt_ref, ftok_ref, fpos_ref,
                        logits_ref, loss_ref, *, vocab):
    """Training path: exact logits + mean cross-entropy, fused in one launch.

    The CE is computed on the in-register block (no re-load from logits_ref).
    """
    block = _gather_block(idx_ref, ftok_ref, fpos_ref)
    logits_ref[...] = block[:, :vocab]

    n, vpad = block.shape
    lane = lax.broadcasted_iota(jnp.int32, (n, vpad), 1)
    valid = lane < vocab                                        # mask pad lanes
    z = jnp.where(valid, block, jnp.float32(-1e30))
    m = jnp.max(z, axis=-1, keepdims=True)
    zc = z - m
    e = jnp.where(valid, jnp.exp(zc), jnp.float32(0.0))
    lse = jnp.log(jnp.sum(e, axis=-1, keepdims=True))           # (n, 1)

    onehot = tgt_ref[...] == lane                                # (n,1) vs (n,128)
    picked = jnp.sum(jnp.where(onehot, zc, jnp.float32(0.0)),
                     axis=-1, keepdims=True)                     # (n, 1)
    nll = lse - picked                                           # no full logp tensor
    loss_ref[...] = jnp.sum(nll, axis=0, keepdims=True) * jnp.float32(1.0 / n)


# ----------------------------------------------------------------------------
# Wrapper
# ----------------------------------------------------------------------------
@functools.partial(jax.jit, static_argnames=("vocab", "with_targets"))
def _bigram_forward_jit(fused, idx, targets, vocab, with_targets):
    B, T = idx.shape
    n = B * T
    idx_i32 = idx.astype(jnp.int32)

    if not with_targets:
        logits = pl.pallas_call(
            functools.partial(_logits_kernel, vocab=vocab),
            out_shape=jax.ShapeDtypeStruct((n, vocab), jnp.float32),
            in_specs=[_SMEM, _VMEM, _VMEM],
            out_specs=_VMEM,
        )(idx_i32, fused["ftok"], fused["fpos"])
        # (n, V) -> (B, T, V) is a contiguous reshape: pure bitcast, no launch.
        return logits.reshape(B, T, vocab)

    tgt = targets.reshape(n, 1).astype(jnp.int32)
    logits, loss = pl.pallas_call(
        functools.partial(_logits_loss_kernel, vocab=vocab),
        out_shape=(jax.ShapeDtypeStruct((n, vocab), jnp.float32),
                   jax.ShapeDtypeStruct((1, 1), jnp.float32)),
        in_specs=[_SMEM, _VMEM, _VMEM, _VMEM],
        out_specs=(_VMEM, _VMEM),
    )(idx_i32, tgt, fused["ftok"], fused["fpos"])
    # PyTorch returns (logits.view(B*T, C), loss) on the targets branch.
    return logits, loss[0, 0]


def bigram_forward(fused, idx, targets=None, *, vocab=VOCAB_SIZE):
    if targets is None:
        return _bigram_forward_jit(fused, idx, None, vocab, False)
    return _bigram_forward_jit(fused, idx, targets, vocab, True)


# ----------------------------------------------------------------------------
# Parameters: raw (torch-like) init + fused/padded tables for the kernel
# ----------------------------------------------------------------------------
def init_params(key, vocab_size, block_size):
    k1, k2, k3, k4 = jax.random.split(key, 4)
    tok = jax.random.normal(k1, (vocab_size, vocab_size), jnp.float32)
    pos = jax.random.normal(k2, (block_size, vocab_size), jnp.float32)
    bound = 1.0 / (vocab_size ** 0.5)
    w = jax.random.uniform(k3, (vocab_size, vocab_size), jnp.float32,
                           -bound, bound)          # torch Linear weight (out, in)
    b = jax.random.uniform(k4, (vocab_size,), jnp.float32, -bound, bound)
    return {"tok": tok, "pos": pos, "w_t": w.T, "b": b.reshape(1, vocab_size)}


def prepare_fused(params, lane_pad=LANE_PAD):
    """Fold the (linear) lm_head into the embedding tables and pad to 128 lanes.

    (tok[idx] + pos) @ W^T + b  ==  (tok @ W^T + b)[idx] + (pos @ W^T)
    so the kernel only needs a row gather + add.  FP summation order changes
    slightly (~1e-6), well within the test tolerance.
    """
    V = params["tok"].shape[0]
    bs = params["pos"].shape[0]
    assert V <= lane_pad
    ftok = params["tok"] @ params["w_t"] + params["b"]        # (V, V)
    fpos = params["pos"] @ params["w_t"]                      # (block_size, V)
    rows = ((V + 7) // 8) * 8                                 # sublane-align rows
    ftok_p = jnp.zeros((rows, lane_pad), jnp.float32).at[:V, :V].set(ftok)
    fpos_p = jnp.zeros((bs, lane_pad), jnp.float32).at[:, :V].set(fpos)
    return {"ftok": ftok_p, "fpos": fpos_p}


# ----------------------------------------------------------------------------
# Plain-JAX reference (uses the raw, un-fused parameters)
# ----------------------------------------------------------------------------
def reference_forward(params, idx, targets=None):
    B, T = idx.shape
    tok_emb = params["tok"][idx]                        # (B, T, V)
    pos_emb = params["pos"][:T]                         # (T, V)
    x = tok_emb + pos_emb[None, :, :]
    logits = x @ params["w_t"] + params["b"][0]         # (B, T, V)
    if targets is None:
        return logits
    V = logits.shape[-1]
    lf = logits.reshape(B * T, V)
    tf = targets.reshape(B * T)
    logp = jax.nn.log_softmax(lf, axis=-1)
    loss = -jnp.mean(logp[jnp.arange(B * T), tf])
    return lf, loss


# ----------------------------------------------------------------------------
# TODO(synk): generate() (autoregressive sampling with torch.multinomial) is a
# host-side loop around this forward pass and is intentionally not kernelized.
if __name__ == "__main__":
    key = jax.random.PRNGKey(0)
    pkey, ikey, tkey = jax.random.split(key, 3)

    params = init_params(pkey, VOCAB_SIZE, BLOCK_SIZE)
    fused = prepare_fused(params)

    B, T = 2, BLOCK_SIZE
    idx = jax.random.randint(ikey, (B, T), 0, VOCAB_SIZE, dtype=jnp.int32)
    targets = jax.random.randint(tkey, (B, T), 0, VOCAB_SIZE, dtype=jnp.int32)

    # inference path (targets=None) -> (B, T, V) logits
    logits = jax.block_until_ready(bigram_forward(fused, idx))

    # training path (with targets) -> ((B*T, V) logits, scalar loss), one launch
    logits_flat, loss = bigram_forward(fused, idx, targets)
    logits_flat = jax.block_until_ready(logits_flat)
    loss = jax.block_until_ready(loss)

    # verify against the plain-JAX reference on the raw parameters
    ref_logits = reference_forward(params, idx)
    ref_lf, ref_loss = reference_forward(params, idx, targets)

    assert logits.shape == (B, T, VOCAB_SIZE)
    assert logits_flat.shape == (B * T, VOCAB_SIZE)
    assert jnp.allclose(logits, ref_logits, atol=5e-4, rtol=5e-4)
    assert jnp.allclose(logits_flat, ref_lf, atol=5e-4, rtol=5e-4)
    assert jnp.allclose(loss, ref_loss, atol=5e-4, rtol=5e-4)

    print("KERNEL_OK")
</pallas_src>

<mosaic_0001>
module attributes {stable_mosaic.version = 11 : i64} {
  func.func @_logits_kernel(%arg0: memref<2x8xi32, #tpu.memory_space<smem>>, %arg1: memref<72x128xf32, #tpu.memory_space<vmem>>, %arg2: memref<8x128xf32, #tpu.memory_space<vmem>>, %arg3: memref<16x65xf32, #tpu.memory_space<vmem>>) attributes {dimension_semantics = [], scalar_prefetch = 0 : i64, scratch_operands = 0 : i64, tpu.core_type = #tpu.core_type<tc>} {
    %c0 = arith.constant 0 : index
    %c0_0 = arith.constant 0 : index
    %0 = vector.load %arg2[%c0, %c0_0] : memref<8x128xf32, #tpu.memory_space<vmem>>, vector<8x128xf32>
    %c0_1 = arith.constant 0 : index
    %c0_2 = arith.constant 0 : index
    %1 = memref.load %arg0[%c0_1, %c0_2] : memref<2x8xi32, #tpu.memory_space<smem>>
    %2 = arith.index_cast %1 : i32 to index
    %c0_3 = arith.constant 0 : index
    %3 = vector.load %arg1[%2, %c0_3] : memref<72x128xf32, #tpu.memory_space<vmem>>, vector<1x128xf32>
    %c0_4 = arith.constant 0 : index
    %c1 = arith.constant 1 : index
    %4 = memref.load %arg0[%c0_4, %c1] : memref<2x8xi32, #tpu.memory_space<smem>>
    %5 = arith.index_cast %4 : i32 to index
    %c0_5 = arith.constant 0 : index
    %6 = vector.load %arg1[%5, %c0_5] : memref<72x128xf32, #tpu.memory_space<vmem>>, vector<1x128xf32>
    %c0_6 = arith.constant 0 : index
    %c2 = arith.constant 2 : index
    %7 = memref.load %arg0[%c0_6, %c2] : memref<2x8xi32, #tpu.memory_space<smem>>
    %8 = arith.index_cast %7 : i32 to index
    %c0_7 = arith.constant 0 : index
    %9 = vector.load %arg1[%8, %c0_7] : memref<72x128xf32, #tpu.memory_space<vmem>>, vector<1x128xf32>
    %c0_8 = arith.constant 0 : index
    %c3 = arith.constant 3 : index
    %10 = memref.load %arg0[%c0_8, %c3] : memref<2x8xi32, #tpu.memory_space<smem>>
    %11 = arith.index_cast %10 : i32 to index
    %c0_9 = arith.constant 0 : index
    %12 = vector.load %arg1[%11, %c0_9] : memref<72x128xf32, #tpu.memory_space<vmem>>, vector<1x128xf32>
    %c0_10 = arith.constant 0 : index
    %c4 = arith.constant 4 : index
    %13 = memref.load %arg0[%c0_10, %c4] : memref<2x8xi32, #tpu.memory_space<smem>>
    %14 = arith.index_cast %13 : i32 to index
    %c0_11 = arith.constant 0 : index
    %15 = vector.load %arg1[%14, %c0_11] : memref<72x128xf32, #tpu.memory_space<vmem>>, vector<1x128xf32>
    %c0_12 = arith.constant 0 : index
    %c5 = arith.constant 5 : index
    %16 = memref.load %arg0[%c0_12, %c5] : memref<2x8xi32, #tpu.memory_space<smem>>
    %17 = arith.index_cast %16 : i32 to index
    %c0_13 = arith.constant 0 : index
    %18 = vector.load %arg1[%17, %c0_13] : memref<72x128xf32, #tpu.memory_space<vmem>>, vector<1x128xf32>
    %c0_14 = arith.constant 0 : index
    %c6 = arith.constant 6 : index
    %19 = memref.load %arg0[%c0_14, %c6] : memref<2x8xi32, #tpu.memory_space<smem>>
    %20 = arith.index_cast %19 : i32 to index
    %c0_15 = arith.constant 0 : index
    %21 = vector.load %arg1[%20, %c0_15] : memref<72x128xf32, #tpu.memory_space<vmem>>, vector<1x128xf32>
    %c0_16 = arith.constant 0 : index
    %c7 = arith.constant 7 : index
    %22 = memref.load %arg0[%c0_16, %c7] : memref<2x8xi32, #tpu.memory_space<smem>>
    %23 = arith.index_cast %22 : i32 to index
    %c0_17 = arith.constant 0 : index
    %24 = vector.load %arg1[%23, %c0_17] : memref<72x128xf32, #tpu.memory_space<vmem>>, vector<1x128xf32>
    %25 = tpu.concatenate %3, %6, %9, %12, %15, %18, %21, %24 in 0 : vector<1x128xf32>, vector<1x128xf32>, vector<1x128xf32>, vector<1x128xf32>, vector<1x128xf32>, vector<1x128xf32>, vector<1x128xf32>, vector<1x128xf32> -> vector<8x128xf32>
    %26 = arith.addf %25, %0 : vector<8x128xf32>
    %c1_18 = arith.constant 1 : index
    %c0_19 = arith.constant 0 : index
    %27 = memref.load %arg0[%c1_18, %c0_19] : memref<2x8xi32, #tpu.memory_space<smem>>
    %28 = arith.index_cast %27 : i32 to index
    %c0_20 = arith.constant 0 : index
    %29 = vector.load %arg1[%28, %c0_20] : memref<72x128xf32, #tpu.memory_space<vmem>>, vector<1x128xf32>
    %c1_21 = arith.constant 1 : index
    %c1_22 = arith.constant 1 : index
    %30 = memref.load %arg0[%c1_21, %c1_22] : memref<2x8xi32, #tpu.memory_space<smem>>
    %31 = arith.index_cast %30 : i32 to index
    %c0_23 = arith.constant 0 : index
    %32 = vector.load %arg1[%31, %c0_23] : memref<72x128xf32, #tpu.memory_space<vmem>>, vector<1x128xf32>
    %c1_24 = arith.constant 1 : index
    %c2_25 = arith.constant 2 : index
    %33 = memref.load %arg0[%c1_24, %c2_25] : memref<2x8xi32, #tpu.memory_space<smem>>
    %34 = arith.index_cast %33 : i32 to index
    %c0_26 = arith.constant 0 : index
    %35 = vector.load %arg1[%34, %c0_26] : memref<72x128xf32, #tpu.memory_space<vmem>>, vector<1x128xf32>
    %c1_27 = arith.constant 1 : index
    %c3_28 = arith.constant 3 : index
    %36 = memref.load %arg0[%c1_27, %c3_28] : memref<2x8xi32, #tpu.memory_space<smem>>
    %37 = arith.index_cast %36 : i32 to index
    %c0_29 = arith.constant 0 : index
    %38 = vector.load %arg1[%37, %c0_29] : memref<72x128xf32, #tpu.memory_space<vmem>>, vector<1x128xf32>
    %c1_30 = arith.constant 1 : index
    %c4_31 = arith.constant 4 : index
    %39 = memref.load %arg0[%c1_30, %c4_31] : memref<2x8xi32, #tpu.memory_space<smem>>
    %40 = arith.index_cast %39 : i32 to index
    %c0_32 = arith.constant 0 : index
    %41 = vector.load %arg1[%40, %c0_32] : memref<72x128xf32, #tpu.memory_space<vmem>>, vector<1x128xf32>
    %c1_33 = arith.constant 1 : index
    %c5_34 = arith.constant 5 : index
    %42 = memref.load %arg0[%c1_33, %c5_34] : memref<2x8xi32, #tpu.memory_space<smem>>
    %43 = arith.index_cast %42 : i32 to index
    %c0_35 = arith.constant 0 : index
    %44 = vector.load %arg1[%43, %c0_35] : memref<72x128xf32, #tpu.memory_space<vmem>>, vector<1x128xf32>
    %c1_36 = arith.constant 1 : index
    %c6_37 = arith.constant 6 : index
    %45 = memref.load %arg0[%c1_36, %c6_37] : memref<2x8xi32, #tpu.memory_space<smem>>
    %46 = arith.index_cast %45 : i32 to index
    %c0_38 = arith.constant 0 : index
    %47 = vector.load %arg1[%46, %c0_38] : memref<72x128xf32, #tpu.memory_space<vmem>>, vector<1x128xf32>
    %c1_39 = arith.constant 1 : index
    %c7_40 = arith.constant 7 : index
    %48 = memref.load %arg0[%c1_39, %c7_40] : memref<2x8xi32, #tpu.memory_space<smem>>
    %49 = arith.index_cast %48 : i32 to index
    %c0_41 = arith.constant 0 : index
    %50 = vector.load %arg1[%49, %c0_41] : memref<72x128xf32, #tpu.memory_space<vmem>>, vector<1x128xf32>
    %51 = tpu.concatenate %29, %32, %35, %38, %41, %44, %47, %50 in 0 : vector<1x128xf32>, vector<1x128xf32>, vector<1x128xf32>, vector<1x128xf32>, vector<1x128xf32>, vector<1x128xf32>, vector<1x128xf32>, vector<1x128xf32> -> vector<8x128xf32>
    %52 = arith.addf %51, %0 : vector<8x128xf32>
    %53 = tpu.concatenate %26, %52 in 0 : vector<8x128xf32>, vector<8x128xf32> -> vector<16x128xf32>
    %54 = vector.extract_strided_slice %53 {offsets = [0, 0], sizes = [16, 65], strides = [1, 1]} : vector<16x128xf32> to vector<16x65xf32>
    %c0_42 = arith.constant 0 : index
    %c0_43 = arith.constant 0 : index
    %55 = vector.load %arg3[%c0_42, %c0_43] : memref<16x65xf32, #tpu.memory_space<vmem>>, vector<16x65xf32>
    tpu.vector_store %arg3[%c0_42, %c0_43], %54 {strides = array<i32>} : memref<16x65xf32, #tpu.memory_space<vmem>>, vector<16x65xf32>,
    return
  }
}

</mosaic_0001>

<bundles_post_ra>
// kernel: _bigram_forward_jit.1
= control target key start
LH: loop header
LB: loop body
LE: loop exit
PB: predicated region body
PF: predicated region fallthrough
CT: control target
= control target key end

     0   :  { %8 = vsyncpa [#allocation5], 0  ;;  %s412_s0 = inlined_call_operand.vmem [shape: s32[2,8], index: 0, kind: input, shape index: {}]   ;;  %s413_s1 = inlined_call_operand.hbm [shape: f32[72,128], index: 1, kind: input, shape index: {}]   ;;  %s414_s2 = inlined_call_operand.hbm [shape: f32[8,128], index: 2, kind: input, shape index: {}]   ;;  %s415_s3 = inlined_call_operand.hbm [shape: f32[16,65], index: 3, kind: output, shape index: {}]  }
   0x1   :  { %9 = vsyncpa [#allocation3], 0 }
   0x2   :  { %10 = vsyncpa [#allocation8], 0 }
   0x3   :  { %11 = vsyncpa [#allocation4], 0  ;;  %s18_s14 = sshll.u32 %s412_s0, 4  ;;  %s19_s14 = int_to_ptr.vmem [resolvable:$true] %s18_s14 }
   0x4   :  { %s227_s15 = scalar_lea.vmem %s19_s14, 32  ;;  %p232_p1 = scmp.lt.s32.totalorder %s19_s14, %s19_s14 }
   0x5   :  { %p228_p0 = scmp.ne.s32.totalorder %s19_s14, %s227_s15  ;;  %p233_p2 = scmp.lt.s32.totalorder %s227_s15, %s227_s15 }
   0x7   :  { %p234_p3 = por %p233_p2, %p232_p1 }
   0x9   :  { %p235_p4 = pnand %p234_p3, %p228_p0 }
   0xb   :  { %238 = shalt.err (!%p235_p4)
}
   0xc   :  { %s313_s16 = smov [#allocation2]   ;;  %s314_s17 = smov [#allocation6]  }
   0xd   :  { %21 = dma.vmem_to_smem %s19_s14, 32, %s313_s16, [#allocation5]  }
   0xe   :  { %s27_s18 = sshll.u32 %s314_s17, 4  ;;  %s239_s21 = scalar_lea.hbm %s413_s1, 1152  ;;  %s28_s18 = int_to_ptr.vmem [resolvable:$true] %s27_s18 }
   0xf   :  { %p240_p5 = scmp.ne.s32.totalorder %s413_s1, %s239_s21  ;;  %p243_p6 = scmp.lt.u32.totalorder %s239_s21, %s413_s1 }
  0x11   :  { %p245_p7 = pnand %p243_p6, %p240_p5 }
  0x13   :  { %248 = shalt.err (!%p245_p7)
}
  0x14   :  { %s249_s25 = scalar_lea.vmem %s28_s18, 1152  ;;  %p254_p9 = scmp.lt.s32.totalorder %s28_s18, %s28_s18 }
  0x15   :  { %p250_p8 = scmp.ne.s32.totalorder %s28_s18, %s249_s25  ;;  %p255_p10 = scmp.lt.s32.totalorder %s249_s25, %s249_s25 }
  0x17   :  { %p256_p11 = por %p255_p10, %p254_p9 }
  0x19   :  { %p257_p12 = pnand %p256_p11, %p250_p8 }
  0x1b   :  { %260 = shalt.err (!%p257_p12)
}
  0x1c   :  { %s315_s26 = smov 128   ;;  %s316_s27 = smov 8  }
  0x1d   :  { %33 = dma.hbm_to_vmem [thread:$0]  %s413_s1, 1152, %s28_s18, [#allocation3], %s315_s26, %s315_s26, %s316_s27  }
  0x1e   :  { %s317_s30 = smov [#allocation7]   ;;  %s261_s7 = scalar_lea.hbm %s414_s2, 128 }
  0x1f   :  { %s40_s4 = sshll.u32 %s317_s30, 4  ;;  %p262_p13 = scmp.ne.s32.totalorder %s414_s2, %s261_s7  ;;  %s41_s4 = int_to_ptr.vmem [resolvable:$true] %s40_s4 }
  0x20   :  { %p265_p0 = scmp.lt.u32.totalorder %s261_s7, %s414_s2 }
  0x22   :  { %p267_p1 = pnand %p265_p0, %p262_p13 }
  0x24   :  { %270 = shalt.err (!%p267_p1)
}
  0x25   :  { %s271_s12 = scalar_lea.vmem %s41_s4, 128  ;;  %p276_p3 = scmp.lt.s32.totalorder %s41_s4, %s41_s4 }
  0x26   :  { %p272_p2 = scmp.ne.s32.totalorder %s41_s4, %s271_s12  ;;  %p277_p4 = scmp.lt.s32.totalorder %s271_s12, %s271_s12 }
  0x28   :  { %p278_p5 = por %p277_p4, %p276_p3 }
  0x2a   :  { %p279_p6 = pnand %p278_p5, %p272_p2 }
  0x2c   :  { %282 = shalt.err (!%p279_p6)
}
  0x2d   :  { %43 = dma.hbm_to_vmem [thread:$0]  %s414_s2, 128, %s41_s4, [#allocation8]  }
  0x2e   :  { %305 = dma.done.wait [#allocation5], 32  }
  0x2f   :  { %306 = vsyncadd [#allocation5], 4294967264 }
  0x30   :  { %307 = dma.done.wait [#allocation3], 1152  }
  0x31   :  { %308 = vsyncadd [#allocation3], 4294966144 }
  0x32   :  { %309 = dma.done.wait [#allocation8], 128  }
  0x33   :  { %310 = vsyncadd [#allocation8], 4294967168 }
  0x34   :  { %53 = sfence }
  0x35   :  { %s55_s14 = sld [smem:[#allocation2]]  ;;  %s206_s15 = sld [smem:[#allocation2 + $0x1]]  ;;  %vm100_vm0 = vcmask 1040384   ;;  %vm102_vm1 = vcmask 1041408   ;;  %vm104_vm2 = vcmask 1042432   ;;  %vm106_vm3 = vcmask 1043456  }
  0x36   :  { %s207_s16 = sld [smem:[#allocation2 + $0x2]]  ;;  %s208_s17 = sld [smem:[#allocation2 + $0x3]]  ;;  %vm108_vm4 = vcmask 1044480   ;;  %vm110_vm5 = vcmask 1045504   ;;  %vm112_vm6 = vcmask 1046528   ;;  %v54_v26 = vld [vmem:[#allocation7] sm:$0xff] }
  0x37   :  { %s209_s18 = sld [smem:[#allocation2 + $0x4]]  ;;  %s210_s19 = sld [smem:[#allocation2 + $0x5]]  ;;  %vm168_vm7 = vcmask 531456  }
  0x38   :  { %s211_s20 = sld [smem:[#allocation2 + $0x6]]  ;;  %s212_s21 = sld [smem:[#allocation2 + $0x7]] }
  0x39   :  { %s369_s22 = sld [smem:[#allocation2 + $0x80]]  ;;  %s371_s23 = sld [smem:[#allocation2 + $0x81]] }
  0x3a   :  { %s373_s2 = sld [smem:[#allocation2 + $0x82]]  ;;  %s375_s0 = sld [smem:[#allocation2 + $0x83]] }
  0x3b   :  { %s56_s24 = scalar_lea.vmem [#allocation6], %s55_s14  ;;  %s59_s25 = scalar_lea.vmem [#allocation6], %s206_s15 }
  0x3c   :  { %v57_v0 = vld [vmem:[%s56_s24] sm:$0x1]  ;;  %s62_s28 = scalar_lea.vmem [#allocation6], %s207_s16  ;;  %s65_s29 = scalar_lea.vmem [#allocation6], %s208_s17 }
  0x3d   :  { %v60_v1 = vld [vmem:[%s59_s25] sm:$0x1]  ;;  %s68_s30 = scalar_lea.vmem [#allocation6], %s209_s18  ;;  %s71_s4 = scalar_lea.vmem [#allocation6], %s210_s19 }
  0x3e   :  { %v63_v2 = vld [vmem:[%s62_s28] sm:$0x1]  ;;  %s74_s5 = scalar_lea.vmem [#allocation6], %s211_s20  ;;  %s77_s6 = scalar_lea.vmem [#allocation6], %s212_s21  ;;  %v80_v8 = vrot.slane %v60_v1, 7 }
  0x3f   :  { %v66_v3 = vld [vmem:[%s65_s29] sm:$0x1]  ;;  %v83_v9 = vrot.slane %v63_v2, 6  ;;  %s116_s7 = scalar_lea.vmem [#allocation6], %s369_s22  ;;  %s119_s8 = scalar_lea.vmem [#allocation6], %s371_s23 }
  0x40   :  { %v69_v4 = vld [vmem:[%s68_s30] sm:$0x1]  ;;  %v86_v10 = vrot.slane %v66_v3, 5  ;;  %v101_v15 = vsel %vm100_vm0, %v57_v0, %v80_v8  ;;  %s122_s9 = scalar_lea.vmem [#allocation6], %s373_s2  ;;  %s217_s10 = sld [smem:[#allocation2 + $0x84]] }
  0x41   :  { %v72_v5 = vld [vmem:[%s71_s4] sm:$0x1]  ;;  %v89_v11 = vrot.slane %v69_v4, 4  ;;  %v103_v18 = vsel %vm102_vm1, %v101_v15, %v83_v9  ;;  %s125_s11 = scalar_lea.vmem [#allocation6], %s375_s0  ;;  %s218_s12 = sld [smem:[#allocation2 + $0x85]] }
  0x42   :  { %v75_v6 = vld [vmem:[%s74_s5] sm:$0x1]  ;;  %v92_v12 = vrot.slane %v72_v5, 3  ;;  %v105_v21 = vsel %vm104_vm2, %v103_v18, %v86_v10  ;;  %s219_s1 = sld [smem:[#allocation2 + $0x86]]  ;;  %s220_s13 = sld [smem:[#allocation2 + $0x87]] }
  0x43   :  { %v78_v7 = vld [vmem:[%s77_s6] sm:$0x1]  ;;  %v95_v13 = vrot.slane %v75_v6, 2  ;;  %v107_v23 = vsel %vm106_vm3, %v105_v21, %v89_v11  ;;  %s318_s18 = smov [#allocation9]  }
  0x44   :  { %v98_v14 = vrot.slane %v78_v7, 1  ;;  %v117_v16 = vld [vmem:[%s116_s7] sm:$0x1]  ;;  %v109_v27 = vsel %vm108_vm4, %v107_v23, %v92_v12  ;;  %s176_s19 = sshll.u32 %s318_s18, 4  ;;  %s177_s19 = int_to_ptr.vmem [resolvable:$true] %s176_s19 }
  0x45   :  { %v120_v17 = vld [vmem:[%s119_s8] sm:$0x1]  ;;  %v111_v29 = vsel %vm110_vm5, %v109_v27, %v95_v13  ;;  %s283_s20 = scalar_lea.vmem %s177_s19, 256  ;;  %p288_p8 = scmp.lt.s32.totalorder %s177_s19, %s177_s19 }
  0x46   :  { %v123_v19 = vld [vmem:[%s122_s9] sm:$0x1]  ;;  %v140_v20 = vrot.slane %v120_v17, 7  ;;  %v113_v31 = vsel %vm112_vm6, %v111_v29, %v98_v14  ;;  %s128_s14 = scalar_lea.vmem [#allocation6], %s217_s10  ;;  %p284_p7 = scmp.ne.s32.totalorder %s177_s19, %s283_s20 }
  0x47   :  { %v126_v22 = vld [vmem:[%s125_s11] sm:$0x1]  ;;  %v143_v24 = vrot.slane %v123_v19, 6  ;;  %v114_v32 = vadd.f32 %v113_v31, %v54_v26  ;;  %s131_s15 = scalar_lea.vmem [#allocation6], %s218_s12  ;;  %p289_p9 = scmp.lt.s32.totalorder %s283_s20, %s283_s20 }
  0x48   :  { %v160_v25 = vsel %vm100_vm0, %v117_v16, %v140_v20  ;;  %v146_v28 = vrot.slane %v126_v22, 5  ;;  %v129_v33 = vld [vmem:[%s128_s14] sm:$0x1]  ;;  %s134_s16 = scalar_lea.vmem [#allocation6], %s219_s1  ;;  %s137_s17 = scalar_lea.vmem [#allocation6], %s220_s13 }
  0x49   :  { %v161_v30 = vsel %vm102_vm1, %v160_v25, %v143_v24  ;;  %169 = vst.msk [vmem:[#allocation9] sm:$0xff] %vm168_vm7, %v114_v32  ;;  %v132_v35 = vld [vmem:[%s131_s15] sm:$0x1]  ;;  %v149_v37 = vrot.slane %v129_v33, 4  ;;  %p290_p10 = por %p289_p9, %p288_p8 }
  0x4a   :  { %v162_v34 = vsel %vm104_vm2, %v161_v30, %v146_v28  ;;  %v135_v36 = vld [vmem:[%s134_s16] sm:$0x1]  ;;  %v152_v39 = vrot.slane %v132_v35, 3 }
  0x4b   :  { %v138_v38 = vld [vmem:[%s137_s17] sm:$0x1]  ;;  %v155_v40 = vrot.slane %v135_v36, 2  ;;  %v163_v42 = vsel %vm106_vm3, %v162_v34, %v149_v37  ;;  %p291_p11 = pnand %p290_p10, %p284_p7 }
  0x4c   :  { %v158_v41 = vrot.slane %v138_v38, 1  ;;  %v164_v43 = vsel %vm108_vm4, %v163_v42, %v152_v39 }
  0x4d   :  { %v165_v44 = vsel %vm110_vm5, %v164_v43, %v155_v40 }
  0x4e   :  { %v166_v45 = vsel %vm112_vm6, %v165_v44, %v158_v41 }
  0x4f   :  { %v167_v46 = vadd.f32 %v166_v45, %v54_v26 }
  0x51   :  { %170 = vst.msk [vmem:[#allocation9 + $0x8] sm:$0xff] %vm168_vm7, %v167_v46 }
  0x52   :  { %294 = shalt.err (!%p291_p11)
}
  0x53   :  { %s295_s23 = scalar_lea.hbm %s415_s3, 256 }
  0x54   :  { %p296_p12 = scmp.ne.s32.totalorder %s415_s3, %s295_s23  ;;  %p299_p13 = scmp.lt.u32.totalorder %s295_s23, %s415_s3 }
  0x56   :  { %p301_p0 = pnand %p299_p13, %p296_p12 }
  0x58   :  { %304 = shalt.err (!%p301_p0)
}
  0x59   :  { %182 = dma.vmem_to_hbm [thread:$0]  %s177_s19, 256, %s415_s3, [#allocation4], %s315_s26, %s315_s26, %s316_s27  }
  0x5a   :  { %311 = dma.done.wait [#allocation4], 256  }
  0x5b   :  { %312 = vsyncadd [#allocation4], 4294967040 }
  0x5c   :  { %186 = vsyncpa [#allocation3], 1 }
  0x5d   :  { %187 = vsyncpa [#allocation8], 1 }
  0x5e   :  { %188 = vsyncpa [#allocation4], 1 }
  0x5f   :  { %189 = vsyncpa [#allocation5], 1 }

</bundles_post_ra>
